<compile_context>
chip_gen: v7x
topology: tpu7x:2x2x1
jax: 0.10.0
libtpu: 0.0.40
codegen_flags: <defaults>
</compile_context>

<pallas_src>
import functools

import jax
import jax.numpy as jnp
from jax.experimental import pallas as pl
from jax.experimental.pallas import tpu as pltpu


def _round_up(n, m):
    return ((n + m - 1) // m) * m


def _fused_mlp_ln_kernel(seg_ref, x_ref, w1_ref, b1_ref, w2_ref, b2_ref,
                         g_ref, beta_ref, o_ref):
    """One row-tile of: LayerNorm(Linear2(ReLU(Linear1(x)))).

    seg_ref is the scalar-prefetched segment-id table (only used by the
    index_maps to pick node vs. edge weights); unused in the body.
    """
    del seg_ref

    # Linear1 on the MXU (bf16 inputs, f32 accumulation) + bias + ReLU.
    h = jnp.dot(x_ref[...], w1_ref[...], preferred_element_type=jnp.float32)
    h = jnp.maximum(h + b1_ref[...].astype(jnp.float32), 0.0)

    # Feed the second matmul in the weight dtype (bf16 -> fast MXU path, halves vregs).
    h = h.astype(w2_ref.dtype)

    # Linear2 on the MXU (f32 accumulation) + bias.
    y = jnp.dot(h, w2_ref[...], preferred_element_type=jnp.float32)
    y = y + b2_ref[...].astype(jnp.float32)

    # LayerNorm over the feature axis, biased variance, eps=1e-5 (PyTorch default).
    # Reductions land on the XLU, rsqrt on the EUP -> nearly free next to the matmuls.
    mean = jnp.mean(y, axis=-1, keepdims=True)
    c = y - mean
    var = jnp.mean(c * c, axis=-1, keepdims=True)
    out = c * jax.lax.rsqrt(var + 1e-5)
    out = out * g_ref[...].astype(jnp.float32) + beta_ref[...].astype(jnp.float32)

    o_ref[...] = out.astype(o_ref.dtype)


@functools.partial(jax.jit, static_argnames=("row_tile", "io_dtype"))
def fused_encoder_mlp_layernorm(x_node, x_edge, node_p, edge_p, *,
                                row_tile=256, io_dtype=jnp.bfloat16):
    """Runs both the node and the edge MLP+LayerNorm in a single pallas_call.

    Rows of both inputs are zero-padded to multiples of `row_tile`, column-padded to a
    common input width, and concatenated.  A scalar-prefetched per-tile segment id
    selects which stacked weight set (node=0 / edge=1) each grid step uses.
    """
    hidden = node_p["w2"].shape[1]
    node_dim = node_p["w1"].shape[0]
    edge_dim = edge_p["w1"].shape[0]
    in_dim = _round_up(max(node_dim, edge_dim), 8)      # sublane-aligned common K

    n_node, n_edge = x_node.shape[0], x_edge.shape[0]
    n_node_pad = max(_round_up(n_node, row_tile), row_tile)
    n_edge_pad = max(_round_up(n_edge, row_tile), row_tile)
    n_node_tiles = n_node_pad // row_tile
    n_edge_tiles = n_edge_pad // row_tile

    def pad_x(x, rows_pad):
        x = x.astype(io_dtype)
        return jnp.pad(x, ((0, rows_pad - x.shape[0]), (0, in_dim - x.shape[1])))

    x_all = jnp.concatenate(
        [pad_x(x_node, n_node_pad), pad_x(x_edge, n_edge_pad)], axis=0)

    def pad_w1(w1):
        w1 = w1.astype(io_dtype)
        return jnp.pad(w1, ((0, in_dim - w1.shape[0]), (0, 0)))

    # Stack node/edge parameters along a leading "segment" axis of size 2.
    w1_all = jnp.stack([pad_w1(node_p["w1"]), pad_w1(edge_p["w1"])])          # [2, in_dim, H]
    w2_all = jnp.stack([node_p["w2"].astype(io_dtype),
                        edge_p["w2"].astype(io_dtype)])                        # [2, H, H]
    b1_all = jnp.stack([node_p["b1"].reshape(1, hidden),
                        edge_p["b1"].reshape(1, hidden)]).astype(jnp.float32)  # [2, 1, H]
    b2_all = jnp.stack([node_p["b2"].reshape(1, hidden),
                        edge_p["b2"].reshape(1, hidden)]).astype(jnp.float32)
    g_all = jnp.stack([node_p["gamma"].reshape(1, hidden),
                       edge_p["gamma"].reshape(1, hidden)]).astype(jnp.float32)
    beta_all = jnp.stack([node_p["beta"].reshape(1, hidden),
                          edge_p["beta"].reshape(1, hidden)]).astype(jnp.float32)

    # Per-tile segment id (0 = node weights, 1 = edge weights), scalar-prefetched to SMEM.
    seg_ids = jnp.concatenate([jnp.zeros((n_node_tiles,), jnp.int32),
                               jnp.ones((n_edge_tiles,), jnp.int32)])

    grid = (n_node_tiles + n_edge_tiles,)
    row_map = lambda i, seg: (i, 0)            # x / out: walk row tiles
    seg_map = lambda i, seg: (seg[i], 0, 0)    # params: pick segment's weight set

    out = pl.pallas_call(
        _fused_mlp_ln_kernel,
        out_shape=jax.ShapeDtypeStruct((n_node_pad + n_edge_pad, hidden), io_dtype),
        grid_spec=pltpu.PrefetchScalarGridSpec(
            num_scalar_prefetch=1,
            grid=grid,
            in_specs=[
                pl.BlockSpec((row_tile, in_dim), row_map),        # x row tile
                pl.BlockSpec((None, in_dim, hidden), seg_map),    # W1   (segment-selected)
                pl.BlockSpec((None, 1, hidden), seg_map),         # b1
                pl.BlockSpec((None, hidden, hidden), seg_map),    # W2
                pl.BlockSpec((None, 1, hidden), seg_map),         # b2
                pl.BlockSpec((None, 1, hidden), seg_map),         # LN gamma
                pl.BlockSpec((None, 1, hidden), seg_map),         # LN beta
            ],
            out_specs=pl.BlockSpec((row_tile, hidden), row_map),
        ),
        compiler_params=pltpu.CompilerParams(
            dimension_semantics=("parallel",),   # independent row tiles -> megacore shardable
        ),
    )(seg_ids, x_all, w1_all, b1_all, w2_all, b2_all, g_all, beta_all)

    h_node = out[:n_node]
    h_edge = out[n_node_pad:n_node_pad + n_edge]
    return h_node, h_edge


def init_mlp_ln_params(key, in_dim, hidden, dtype=jnp.float32):
    """Deterministic synthetic params for MLP([in_dim, hidden, hidden]) + LayerNorm(hidden)."""
    k1, k2 = jax.random.split(key)
    scale1 = 1.0 / jnp.sqrt(jnp.array(in_dim, dtype))
    scale2 = 1.0 / jnp.sqrt(jnp.array(hidden, dtype))
    w1 = jax.random.normal(k1, (in_dim, hidden), dtype) * scale1
    b1 = jnp.zeros((hidden,), dtype)
    w2 = jax.random.normal(k2, (hidden, hidden), dtype) * scale2
    b2 = jnp.zeros((hidden,), dtype)
    gamma = jnp.ones((hidden,), dtype)   # LayerNorm weight init
    beta = jnp.zeros((hidden,), dtype)   # LayerNorm bias init
    return dict(w1=w1, b1=b1, w2=w2, b2=b2, gamma=gamma, beta=beta)


class EncoderPallas:
    """MGN Encoder: embeds node features and edge features into hidden_size vectors."""

    # NOTE: for lane-dense (unmasked) stores pick hidden_size as a multiple of 128.
    def __init__(self, node_dim, edge_dim, hidden_size, key,
                 row_tile=256, io_dtype=jnp.bfloat16):
        kn, ke = jax.random.split(key)
        self.hidden_size = hidden_size
        self.row_tile = row_tile
        self.io_dtype = io_dtype
        self.node_params = init_mlp_ln_params(kn, node_dim, hidden_size)
        self.edge_params = init_mlp_ln_params(ke, edge_dim, hidden_size)

    def __call__(self, data):
        # data: dict with 'x' [N, node_dim] and 'edge_attr' [E, edge_dim]
        data = dict(data)
        h_node, h_edge = fused_encoder_mlp_layernorm(
            data["x"], data["edge_attr"], self.node_params, self.edge_params,
            row_tile=self.row_tile, io_dtype=self.io_dtype)
        data["h_node"] = h_node
        data["h_edge"] = h_edge
        return data


def _reference(x, p, io_dtype):
    """Plain-JAX reference mirroring the kernel's bf16-I/O / f32-accumulate path."""
    xq = x.astype(io_dtype)
    w1 = p["w1"].astype(io_dtype)
    w2 = p["w2"].astype(io_dtype)
    h = jnp.dot(xq, w1, preferred_element_type=jnp.float32) + p["b1"]
    h = jnp.maximum(h, 0.0).astype(io_dtype)
    y = jnp.dot(h, w2, preferred_element_type=jnp.float32) + p["b2"]
    mean = jnp.mean(y, axis=-1, keepdims=True)
    var = jnp.mean((y - mean) ** 2, axis=-1, keepdims=True)
    out = (y - mean) * jax.lax.rsqrt(var + 1e-5) * p["gamma"] + p["beta"]
    return out.astype(io_dtype)


if __name__ == "__main__":
    key = jax.random.PRNGKey(0)
    k_param, k_x, k_e = jax.random.split(key, 3)

    # Typical MGN sizes: small feature dims, hidden_size=128 (lane-dense), modest graph.
    node_dim, edge_dim, hidden = 6, 3, 128
    num_nodes, num_edges = 200, 600      # deliberately NOT multiples of row_tile

    x = jax.random.normal(k_x, (num_nodes, node_dim), jnp.float32)
    edge_attr = jax.random.normal(k_e, (num_edges, edge_dim), jnp.float32)

    enc = EncoderPallas(node_dim, edge_dim, hidden, k_param, row_tile=256)
    data = {"x": x, "edge_attr": edge_attr}
    out = enc(data)

    h_node = jax.block_until_ready(out["h_node"])
    h_edge = jax.block_until_ready(out["h_edge"])

    # Correctness check against a plain-JAX reference following the same precision path.
    ref_node = _reference(x, enc.node_params, enc.io_dtype)
    ref_edge = _reference(edge_attr, enc.edge_params, enc.io_dtype)
    assert h_node.shape == (num_nodes, hidden)
    assert h_edge.shape == (num_edges, hidden)
    assert jnp.all(jnp.isfinite(h_node.astype(jnp.float32)))
    assert jnp.all(jnp.isfinite(h_edge.astype(jnp.float32)))
    assert jnp.allclose(h_node.astype(jnp.float32), ref_node.astype(jnp.float32),
                        atol=5e-2, rtol=5e-2)
    assert jnp.allclose(h_edge.astype(jnp.float32), ref_edge.astype(jnp.float32),
                        atol=5e-2, rtol=5e-2)

    print("KERNEL_OK")
</pallas_src>

<mosaic_0001>
module attributes {stable_mosaic.version = 11 : i64} {
  func.func @_fused_mlp_ln_kernel(%arg0: i32, %arg1: memref<4xi32, #tpu.memory_space<smem>>, %arg2: memref<256x8xbf16, #tpu.memory_space<vmem>>, %arg3: memref<1x8x128xbf16, #tpu.memory_space<vmem>>, %arg4: memref<1x1x128xf32, #tpu.memory_space<vmem>>, %arg5: memref<1x128x128xbf16, #tpu.memory_space<vmem>>, %arg6: memref<1x1x128xf32, #tpu.memory_space<vmem>>, %arg7: memref<1x1x128xf32, #tpu.memory_space<vmem>>, %arg8: memref<1x1x128xf32, #tpu.memory_space<vmem>>, %arg9: memref<256x128xbf16, #tpu.memory_space<vmem>>) attributes {dimension_semantics = [#tpu.dimension_semantics<parallel>], iteration_bounds = array<i64: 4>, scalar_prefetch = 1 : i64, scratch_operands = 0 : i64, tpu.core_type = #tpu.core_type<tc>, window_params = [{transform_indices = @transform_0, window_bounds = array<i64: 256, 8>}, {transform_indices = @transform_1, window_bounds = array<i64: 1, 8, 128>}, {transform_indices = @transform_2, window_bounds = array<i64: 1, 1, 128>}, {transform_indices = @transform_3, window_bounds = array<i64: 1, 128, 128>}, {transform_indices = @transform_4, window_bounds = array<i64: 1, 1, 128>}, {transform_indices = @transform_5, window_bounds = array<i64: 1, 1, 128>}, {transform_indices = @transform_6, window_bounds = array<i64: 1, 1, 128>}, {transform_indices = @transform_7, window_bounds = array<i64: 256, 128>}]} {
    %c0 = arith.constant 0 : index
    %c0_0 = arith.constant 0 : index
    %0 = vector.load %arg2[%c0, %c0_0] : memref<256x8xbf16, #tpu.memory_space<vmem>>, vector<256x8xbf16>
    %c0_1 = arith.constant 0 : index
    %c0_2 = arith.constant 0 : index
    %c0_3 = arith.constant 0 : index
    %1 = vector.load %arg3[%c0_1, %c0_2, %c0_3] : memref<1x8x128xbf16, #tpu.memory_space<vmem>>, vector<1x8x128xbf16>
    %2 = vector.shape_cast %1 : vector<1x8x128xbf16> to vector<8x128xbf16>
    %cst = arith.constant dense<0.000000e+00> : vector<256x128xf32>
    %3 = tpu.matmul %0, %2, %cst {dimension_numbers = #tpu.dot_dimension_numbers<[1], [0], [0], [1], [0, 0, 1, 1], [], []>} : vector<256x8xbf16>, vector<8x128xbf16>, vector<256x128xf32> -> vector<256x128xf32>
    %c0_4 = arith.constant 0 : index
    %c0_5 = arith.constant 0 : index
    %c0_6 = arith.constant 0 : index
    %4 = vector.load %arg4[%c0_4, %c0_5, %c0_6] : memref<1x1x128xf32, #tpu.memory_space<vmem>>, vector<1x1x128xf32>
    %5 = vector.shape_cast %4 : vector<1x1x128xf32> to vector<1x128xf32>
    %6 = vector.broadcast %5 : vector<1x128xf32> to vector<256x128xf32>
    %7 = arith.addf %3, %6 : vector<256x128xf32>
    %cst_7 = arith.constant 0.000000e+00 : f32
    %8 = vector.broadcast %cst_7 : f32 to vector<256x128xf32>
    %9 = arith.maximumf %7, %8 : vector<256x128xf32>
    %10 = arith.truncf %9 : vector<256x128xf32> to vector<256x128xbf16>
    %c0_8 = arith.constant 0 : index
    %c0_9 = arith.constant 0 : index
    %c0_10 = arith.constant 0 : index
    %11 = vector.load %arg5[%c0_8, %c0_9, %c0_10] : memref<1x128x128xbf16, #tpu.memory_space<vmem>>, vector<1x128x128xbf16>
    %12 = vector.shape_cast %11 : vector<1x128x128xbf16> to vector<128x128xbf16>
    %cst_11 = arith.constant dense<0.000000e+00> : vector<256x128xf32>
    %13 = tpu.matmul %10, %12, %cst_11 {dimension_numbers = #tpu.dot_dimension_numbers<[1], [0], [0], [1], [0, 0, 1, 1], [], []>} : vector<256x128xbf16>, vector<128x128xbf16>, vector<256x128xf32> -> vector<256x128xf32>
    %c0_12 = arith.constant 0 : index
    %c0_13 = arith.constant 0 : index
    %c0_14 = arith.constant 0 : index
    %14 = vector.load %arg6[%c0_12, %c0_13, %c0_14] : memref<1x1x128xf32, #tpu.memory_space<vmem>>, vector<1x1x128xf32>
    %15 = vector.shape_cast %14 : vector<1x1x128xf32> to vector<1x128xf32>
    %16 = vector.broadcast %15 : vector<1x128xf32> to vector<256x128xf32>
    %17 = arith.addf %13, %16 : vector<256x128xf32>
    %cst_15 = arith.constant dense<0.000000e+00> : vector<256xf32>
    %18 = vector.multi_reduction <add>, %17, %cst_15 [1] : vector<256x128xf32> to vector<256xf32>
    %19 = vector.shape_cast %18 : vector<256xf32> to vector<256x1xf32>
    %cst_16 = arith.constant 1.280000e+02 : f32
    %20 = vector.broadcast %cst_16 : f32 to vector<256x1xf32>
    %21 = arith.divf %19, %20 : vector<256x1xf32>
    %22 = vector.broadcast %21 : vector<256x1xf32> to vector<256x128xf32>
    %23 = arith.subf %17, %22 : vector<256x128xf32>
    %24 = arith.mulf %23, %23 : vector<256x128xf32>
    %cst_17 = arith.constant dense<0.000000e+00> : vector<256xf32>
    %25 = vector.multi_reduction <add>, %24, %cst_17 [1] : vector<256x128xf32> to vector<256xf32>
    %26 = vector.shape_cast %25 : vector<256xf32> to vector<256x1xf32>
    %cst_18 = arith.constant 1.280000e+02 : f32
    %27 = vector.broadcast %cst_18 : f32 to vector<256x1xf32>
    %28 = arith.divf %26, %27 : vector<256x1xf32>
    %cst_19 = arith.constant 9.99999974E-6 : f32
    %29 = vector.broadcast %cst_19 : f32 to vector<256x1xf32>
    %30 = arith.addf %28, %29 : vector<256x1xf32>
    %31 = math.rsqrt %30 : vector<256x1xf32>
    %32 = vector.broadcast %31 : vector<256x1xf32> to vector<256x128xf32>
    %33 = arith.mulf %23, %32 : vector<256x128xf32>
    %c0_20 = arith.constant 0 : index
    %c0_21 = arith.constant 0 : index
    %c0_22 = arith.constant 0 : index
    %34 = vector.load %arg7[%c0_20, %c0_21, %c0_22] : memref<1x1x128xf32, #tpu.memory_space<vmem>>, vector<1x1x128xf32>
    %35 = vector.shape_cast %34 : vector<1x1x128xf32> to vector<1x128xf32>
    %36 = vector.broadcast %35 : vector<1x128xf32> to vector<256x128xf32>
    %37 = arith.mulf %33, %36 : vector<256x128xf32>
    %c0_23 = arith.constant 0 : index
    %c0_24 = arith.constant 0 : index
    %c0_25 = arith.constant 0 : index
    %38 = vector.load %arg8[%c0_23, %c0_24, %c0_25] : memref<1x1x128xf32, #tpu.memory_space<vmem>>, vector<1x1x128xf32>
    %39 = vector.shape_cast %38 : vector<1x1x128xf32> to vector<1x128xf32>
    %40 = vector.broadcast %39 : vector<1x128xf32> to vector<256x128xf32>
    %41 = arith.addf %37, %40 : vector<256x128xf32>
    %42 = arith.truncf %41 : vector<256x128xf32> to vector<256x128xbf16>
    %c0_26 = arith.constant 0 : index
    %c0_27 = arith.constant 0 : index
    %43 = vector.load %arg9[%c0_26, %c0_27] : memref<256x128xbf16, #tpu.memory_space<vmem>>, vector<256x128xbf16>
    tpu.vector_store %arg9[%c0_26, %c0_27], %42 {strides = array<i32>} : memref<256x128xbf16, #tpu.memory_space<vmem>>, vector<256x128xbf16>,
    return
  }
  func.func @transform_0(%arg0: i32, %arg1: memref<4xi32, #tpu.memory_space<smem>>) -> (i32, i32) {
    %c0_i32 = arith.constant 0 : i32
    %c0_i32_0 = arith.constant 0 : i32
    return %arg0, %c0_i32 : i32, i32
  }
  func.func @transform_1(%arg0: i32, %arg1: memref<4xi32, #tpu.memory_space<smem>>) -> (i32, i32, i32) {
    %0 = arith.index_cast %arg0 : i32 to index
    %1 = memref.load %arg1[%0] : memref<4xi32, #tpu.memory_space<smem>>
    %c0_i32 = arith.constant 0 : i32
    %c0_i32_0 = arith.constant 0 : i32
    %c0_i32_1 = arith.constant 0 : i32
    return %1, %c0_i32, %c0_i32_0 : i32, i32, i32
  }
  func.func @transform_2(%arg0: i32, %arg1: memref<4xi32, #tpu.memory_space<smem>>) -> (i32, i32, i32) {
    %0 = arith.index_cast %arg0 : i32 to index
    %1 = memref.load %arg1[%0] : memref<4xi32, #tpu.memory_space<smem>>
    %c0_i32 = arith.constant 0 : i32
    %c0_i32_0 = arith.constant 0 : i32
    %c0_i32_1 = arith.constant 0 : i32
    return %1, %c0_i32, %c0_i32_0 : i32, i32, i32
  }
  func.func @transform_3(%arg0: i32, %arg1: memref<4xi32, #tpu.memory_space<smem>>) -> (i32, i32, i32) {
    %0 = arith.index_cast %arg0 : i32 to index
    %1 = memref.load %arg1[%0] : memref<4xi32, #tpu.memory_space<smem>>
    %c0_i32 = arith.constant 0 : i32
    %c0_i32_0 = arith.constant 0 : i32
    %c0_i32_1 = arith.constant 0 : i32
    return %1, %c0_i32, %c0_i32_0 : i32, i32, i32
  }
  func.func @transform_4(%arg0: i32, %arg1: memref<4xi32, #tpu.memory_space<smem>>) -> (i32, i32, i32) {
    %0 = arith.index_cast %arg0 : i32 to index
    %1 = memref.load %arg1[%0] : memref<4xi32, #tpu.memory_space<smem>>
    %c0_i32 = arith.constant 0 : i32
    %c0_i32_0 = arith.constant 0 : i32
    %c0_i32_1 = arith.constant 0 : i32
    return %1, %c0_i32, %c0_i32_0 : i32, i32, i32
  }
  func.func @transform_5(%arg0: i32, %arg1: memref<4xi32, #tpu.memory_space<smem>>) -> (i32, i32, i32) {
    %0 = arith.index_cast %arg0 : i32 to index
    %1 = memref.load %arg1[%0] : memref<4xi32, #tpu.memory_space<smem>>
    %c0_i32 = arith.constant 0 : i32
    %c0_i32_0 = arith.constant 0 : i32
    %c0_i32_1 = arith.constant 0 : i32
    return %1, %c0_i32, %c0_i32_0 : i32, i32, i32
  }
  func.func @transform_6(%arg0: i32, %arg1: memref<4xi32, #tpu.memory_space<smem>>) -> (i32, i32, i32) {
    %0 = arith.index_cast %arg0 : i32 to index
    %1 = memref.load %arg1[%0] : memref<4xi32, #tpu.memory_space<smem>>
    %c0_i32 = arith.constant 0 : i32
    %c0_i32_0 = arith.constant 0 : i32
    %c0_i32_1 = arith.constant 0 : i32
    return %1, %c0_i32, %c0_i32_0 : i32, i32, i32
  }
  func.func @transform_7(%arg0: i32, %arg1: memref<4xi32, #tpu.memory_space<smem>>) -> (i32, i32) {
    %c0_i32 = arith.constant 0 : i32
    %c0_i32_0 = arith.constant 0 : i32
    return %arg0, %c0_i32 : i32, i32
  }
}

</mosaic_0001>

<bundles_post_ra>
// kernel: fused_encoder_mlp_layernorm.1
= control target key start
LH: loop header
LB: loop body
LE: loop exit
PB: predicated region body
PF: predicated region fallthrough
CT: control target
= control target key end

     0   :  { %s2809_s0 = inlined_call_operand.vmem [shape: s32[4], index: 0, kind: input, shape index: {}]   ;;  %s2810_s1 = inlined_call_operand.vmem [shape: bf16[1024,8], index: 1, kind: input, shape index: {}]   ;;  %s2811_s2 = inlined_call_operand.vmem [shape: bf16[2,8,128], index: 2, kind: input, shape index: {}]   ;;  %s2812_s3 = inlined_call_operand.vmem [shape: f32[2,1,128], index: 3, kind: input, shape index: {}]   ;;  %s2813_s4 = inlined_call_operand.vmem [shape: bf16[2,128,128], index: 4, kind: input, shape index: {}]   ;;  %s2814_s5 = inlined_call_operand.vmem [shape: f32[2,1,128], index: 5, kind: input, shape index: {}]   ;;  %s2815_s6 = inlined_call_operand.vmem [shape: f32[2,1,128], index: 6, kind: input, shape index: {}]   ;;  %s2816_s7 = inlined_call_operand.vmem [shape: f32[2,1,128], index: 7, kind: input, shape index: {}]   ;;  %s2817_s8 = inlined_call_operand.vmem [shape: bf16[1024,128], index: 8, kind: output, shape index: {}]  }
   0x1   :  { %s13_s29 = sshll.u32 %s2809_s0, 4  ;;  %s14_s29 = int_to_ptr.vmem [resolvable:$true] %s13_s29 }
   0x2   :  { %s2201_s30 = scalar_lea.vmem %s14_s29, 16  ;;  %p2206_p1 = scmp.lt.s32.totalorder %s14_s29, %s14_s29 }
   0x3   :  { %p2202_p0 = scmp.ne.s32.totalorder %s14_s29, %s2201_s30  ;;  %p2207_p2 = scmp.lt.s32.totalorder %s2201_s30, %s2201_s30 }
   0x5   :  { %p2208_p3 = por %p2207_p2, %p2206_p1 }
   0x7   :  { %p2209_p4 = pnand %p2208_p3, %p2202_p0 }
   0x9   :  { %2212 = shalt.err (!%p2209_p4)  }
   0xa   :  { %s2223_s9 = smov [#allocation3]  }
   0xb   :  { %16 = dma.vmem_to_smem %s14_s29, 16, %s2223_s9, [#allocation2] }
   0xc   :  { %2217 = dma.done.wait [#allocation2], 16 }
   0xd   :  { %2218 = vsyncadd [#allocation2], 4294967280 }
   0xe   :  { %18 = sfence }
   0xf   :  { %s2272_s10 = smov 0  }
  0x10 LB: > { %s2278_s0 = sadd.s32 4294967295, %s2221_s10   ;;  %p1750_p5 = scmp.ge.s32.totalorder %s2221_s10, 1  ;;  %s2221_s10 = sphi %s2272_s10, %s24_s10  }
  0x11   : > { %p320_p6 = scmp.lt.s32.totalorder %s2221_s10, 5 }
  0x13   : > { %p321_p7 = pnand %p1750_p5, %p320_p6 }
  0x14   : > { %s385_s11 = sld [smem:[#allocation3 + %s2278_s0]] (!%p321_p7)  ;;  %s1751_s12 = sshll.u32 (!%p321_p7), %s2278_s0, 5  ;;  %vm545_vm0 = vcmask (!%p321_p7), 64512   ;;  %vm594_vm1 = vcmask (!%p321_p7), 1043456  }
  0x15   : > { %324 = sbr.rel (%p321_p7) target bundleno = 851 (0x353), region = 48  ;;  %p380_p8 = scmp.lt.s32.totalorder (!%p321_p7), %s1751_s12, 127 }
  0x16   : > { %s396_s13 = sld [smem:[#allocation3 + %s2278_s0]] (!%p321_p7) }
  0x17   : > { %s391_s26 = sld [smem:[#allocation3 + %s2278_s0]] (!%p321_p7) }
  0x18   : > { %s403_s30 = sld [smem:[#allocation3 + %s2278_s0]] (!%p321_p7) }
  0x19   : > { %s408_s15 = sld [smem:[#allocation3 + %s2278_s0]] (!%p321_p7) }
  0x1a   : > { %p386_p9 = scmp.lt.s32.totalorder (!%p321_p7), %s385_s11, 1  ;;  %s413_s16 = sld [smem:[#allocation3 + %s2278_s0]] (!%p321_p7) }
  0x1c   : > { %s2819_s12 = smov (!%p380_p8, %s1751_s12), 127  ;;  %s2821_s11 = smov (!%p386_p9, %s385_s11), 1 }
  0x1d   : > { %s1752_s14 = sshll.u32 %s2819_s12, 2  ;;  %s1753_s18 = sshll.u32 %s2821_s11, 2 }
  0x1e   : > { %s2293_s17 = scalar_lea.vmem %s2810_s1, %s1752_s14  ;;  %p397_p10 = scmp.lt.s32.totalorder %s396_s13, 1 }
  0x1f   : > { %v2113_v0 = vld [vmem:[%s2293_s17] sm:$0xff]   ;;  %s389_s21 = scalar_lea.vmem %s2811_s2, %s1753_s18  ;;  %v2114_v3 = vld [vmem:[%s2293_s17 + $0x8] sm:$0xff]   ;;  %v2115_v4 = vld [vmem:[%s2293_s17 + $0x10] sm:$0xff]   ;;  %p392_p11 = scmp.lt.s32.totalorder %s391_s26, 1 }
  0x20   : > { %2007 = vmatprep.mubr.msk.bf16.mxu0 %vm545_vm0, %v2113_v0  ;;  %v457_v1 = vld [vmem:[%s389_s21] sm:$0xf]  ;;  %s2823_s13 = smov (!%p397_p10, %s396_s13), 1  ;;  %v2116_v5 = vld [vmem:[%s2293_s17 + $0x18] sm:$0xff]   ;;  %v2118_v10 = vld [vmem:[%s2293_s17 + $0x28] sm:$0xff]   ;;  %p404_p12 = scmp.lt.s32.totalorder %s403_s30, 1 }
  0x21   : > { %2103 = vmatprep.subr.msk.bf16.mxu0 %vm594_vm1, %v457_v1  ;;  %v596_v2 = vsel %vm594_vm1, %v457_v1, 0  ;;  %s1836_s22 = sshll.u32 %s2823_s13, 6  ;;  %v2117_v6 = vld [vmem:[%s2293_s17 + $0x20] sm:$0xff]   ;;  %v2119_v11 = vld [vmem:[%s2293_s17 + $0x30] sm:$0xff]   ;;  %v2120_v14 = vld [vmem:[%s2293_s17 + $0x38] sm:$0xff]   ;;  %s2825_s26 = smov (!%p392_p11, %s391_s26), 1 }
  0x22   : > { %2006 = vmatpush3.bf16.msra.mxu0 %v596_v2  ;;  %s2308_s25 = scalar_lea.vmem %s2813_s4, %s1836_s22  ;;  %v2121_v15 = vld [vmem:[%s2293_s17 + $0x40] sm:$0xff]   ;;  %v2122_v18 = vld [vmem:[%s2293_s17 + $0x48] sm:$0xff]   ;;  %v2123_v19 = vld [vmem:[%s2293_s17 + $0x50] sm:$0xff]   ;;  %s394_s29 = scalar_lea.vmem %s2812_s3, %s2825_s26 }
  0x23   : > { %v2129_v7 = vld [vmem:[%s2308_s25] sm:$0xff]   ;;  %v2130_v8 = vld [vmem:[%s2308_s25 + $0x8] sm:$0xff]   ;;  %v2131_v9 = vld [vmem:[%s2308_s25 + $0x10] sm:$0xff]   ;;  %s2827_s30 = smov (!%p404_p12, %s403_s30), 1  ;;  %p409_p13 = scmp.lt.s32.totalorder %s408_s15, 1 }
  0x24   : > { %2039 = vmatprep.subr.bf16.mxu0 %v2129_v7  ;;  %2087 = vmatprep.subr.bf16.mxu1 %v2129_v7  ;;  %v2132_v12 = vld [vmem:[%s2308_s25 + $0x18] sm:$0xff]   ;;  %v2133_v13 = vld [vmem:[%s2308_s25 + $0x20] sm:$0xff]   ;;  %v2134_v16 = vld [vmem:[%s2308_s25 + $0x28] sm:$0xff]   ;;  %s406_s13 = scalar_lea.vmem %s2814_s5, %s2827_s30  ;;  %p414_p0 = scmp.lt.s32.totalorder %s413_s16, 1 }
  0x25   : > { %2008 = vmatmul.mubr.msk.bf16.vlgmr.msra.gmra.mrb[0].mxu0 %vm545_vm0, %v2114_v3  ;;  %2095 = vmatpush3.bf16.msra.mxu1 %v2129_v7  ;;  %v2135_v17 = vld [vmem:[%s2308_s25 + $0x30] sm:$0xff]   ;;  %v2124_v20 = vld [vmem:[%s2293_s17 + $0x58] sm:$0xff]   ;;  %v2125_v21 = vld [vmem:[%s2293_s17 + $0x60] sm:$0xff]   ;;  %s2829_s15 = smov (!%p409_p13, %s408_s15), 1  ;;  %s2701_s24 = scalar_lea.vmem %s2817_s8, %s1752_s14 }
  0x26   : > { %2011 = vmatprep.mubr.msk.bf16.mxu0 %vm545_vm0, %v2115_v4  ;;  %2040 = vmatpush3.bf16.msra.mxu0 %v2129_v7  ;;  %v2126_v22 = vld [vmem:[%s2293_s17 + $0x68] sm:$0xff]   ;;  %v2127_v23 = vld [vmem:[%s2293_s17 + $0x70] sm:$0xff]   ;;  %v2128_v24 = vld [vmem:[%s2293_s17 + $0x78] sm:$0xff]   ;;  %s2831_s16 = smov (!%p414_p0, %s413_s16), 1  ;;  %s411_s18 = scalar_lea.vmem %s2815_s6, %s2829_s15 }
  0x27   : > { %2041 = vmatprep.subr.bf16.mxu0 %v2130_v8  ;;  %2088 = vmatprep.subr.bf16.mxu1 %v2130_v8  ;;  %v2136_v25 = vld [vmem:[%s2308_s25 + $0x38] sm:$0xff]   ;;  %v2347_v26 = vld [vmem:[%s394_s29] ss:$0 sm:$0xff]  ;;  %s416_s21 = scalar_lea.vmem %s2816_s7, %s2831_s16 }
  0x29   : > { %2096 = vmatpush3.bf16.msra.mxu1 %v2130_v8 }
  0x2a   : > { %2042 = vmatpush3.bf16.msra.mxu0 %v2130_v8  ;;  %2089 = vmatprep.subr.bf16.mxu1 %v2131_v9 }
  0x2b   : > { %2043 = vmatprep.subr.bf16.mxu0 %v2131_v9 }
  0x2d   : > { %2012 = vmatmul.mubr.msk.bf16.gmra.mrb[4].mxu0 %vm545_vm0, %v2116_v5  ;;  %2097 = vmatpush3.bf16.msra.mxu1 %v2131_v9 }
  0x2e   : > { %2015 = vmatprep.mubr.msk.bf16.mxu0 %vm545_vm0, %v2117_v6  ;;  %2044 = vmatpush3.bf16.msra.mxu0 %v2131_v9 }
  0x2f   : > { %2045 = vmatprep.subr.bf16.mxu0 %v2132_v12  ;;  %2090 = vmatprep.subr.bf16.mxu1 %v2132_v12 }
  0x31   : > { %2098 = vmatpush3.bf16.msra.mxu1 %v2132_v12 }
  0x32   : > { %2046 = vmatpush3.bf16.msra.mxu0 %v2132_v12  ;;  %2091 = vmatprep.subr.bf16.mxu1 %v2133_v13 }
  0x33   : > { %2047 = vmatprep.subr.bf16.mxu0 %v2133_v13 }
  0x35   : > { %2016 = vmatmul.mubr.msk.bf16.gmra.mrb[8].mxu0 %vm545_vm0, %v2118_v10  ;;  %2099 = vmatpush3.bf16.msra.mxu1 %v2133_v13 }
  0x36   : > { %2019 = vmatprep.mubr.msk.bf16.mxu0 %vm545_vm0, %v2119_v11  ;;  %2048 = vmatpush3.bf16.msra.mxu0 %v2133_v13 }
  0x37   : > { %2049 = vmatprep.subr.bf16.mxu0 %v2134_v16  ;;  %2092 = vmatprep.subr.bf16.mxu1 %v2134_v16 }
  0x39   : > { %2100 = vmatpush3.bf16.msra.mxu1 %v2134_v16 }
  0x3a   : > { %2050 = vmatpush3.bf16.msra.mxu0 %v2134_v16  ;;  %2093 = vmatprep.subr.bf16.mxu1 %v2135_v17 }
  0x3b   : > { %2051 = vmatprep.subr.bf16.mxu0 %v2135_v17 }
  0x3d   : > { %2020 = vmatmul.mubr.msk.bf16.gmra.mrb[12].mxu0 %vm545_vm0, %v2120_v14  ;;  %2101 = vmatpush3.bf16.msra.mxu1 %v2135_v17 }
  0x3e   : > { %2023 = vmatprep.mubr.msk.bf16.mxu0 %vm545_vm0, %v2121_v15  ;;  %2052 = vmatpush3.bf16.msra.mxu0 %v2135_v17 }
  0x3f   : > { %2053 = vmatprep.subr.bf16.mxu0 %v2136_v25  ;;  %2094 = vmatprep.subr.bf16.mxu1 %v2136_v25 }
  0x41   : > { %2102 = vmatpush3.bf16.msra.mxu1 %v2136_v25 }
  0x42   : > { %2054 = vmatpush3.bf16.msra.mxu0 %v2136_v25 }
  0x45   : > { %2024 = vmatmul.mubr.msk.bf16.gmra.mrb[16].mxu0 %vm545_vm0, %v2122_v18 }
  0x46   : > { %2027 = vmatprep.mubr.msk.bf16.mxu0 %vm545_vm0, %v2123_v19 }
  0x4d   : > { %2028 = vmatmul.mubr.msk.bf16.gmra.mrb[20].mxu0 %vm545_vm0, %v2124_v20 }
  0x4e   : > { %2031 = vmatprep.mubr.msk.bf16.mxu0 %vm545_vm0, %v2125_v21 }
  0x55   : > { %2032 = vmatmul.mubr.msk.bf16.gmra.mrb[24].mxu0 %vm545_vm0, %v2126_v22 }
  0x56   : > { %2035 = vmatprep.mubr.msk.bf16.mxu0 %vm545_vm0, %v2127_v23 }
  0x5d   : > { %2036 = vmatmul.mubr.msk.bf16.gmra.mrb[28].mxu0 %vm545_vm0, %v2128_v24 }
  0xf8   : > { %v2009_v27 = vpop.f32.mrb[0].mxu0 }
  0xf9   : > { %v641_v28 = vadd.f32 %v2009_v27, %v2347_v26  ;;  %v632_v29 = vpop.f32.mrb[1].mxu0 }
  0xfa   : > { %v633_v30 = vadd.f32 %v2347_v26, %v632_v29  ;;  %v2010_v31 = vpop.f32.mrb[2].mxu0 }
  0xfb   : > { %v644_v32 = vadd.f32 %v2010_v31, %v2347_v26  ;;  %v635_v33 = vpop.f32.mrb[3].mxu0  ;;  %v761_v35 = vmax.f32 %v641_v28, 0.0 }
  0xfc   : > { %v636_v34 = vadd.f32 %v2347_v26, %v635_v33  ;;  %v759_v37 = vmax.f32 %v633_v30, 0.0 }
  0xfd   : > { %v762_v36 = vmax.f32 %v644_v32, 0.0 }
  0xfe   : > { %v760_v38 = vmax.f32 %v636_v34, 0.0 }
  0xff   : > { %v792_v39 = vpack.c.bf16 %v762_v36, %v761_v35 }
 0x100   : > { %v791_v40 = vpack.c.bf16 %v760_v38, %v759_v37  ;;  %v2013_v41 = vpop.f32.mrb[4].mxu0 }
 0x101   : > { %v657_v42 = vadd.f32 %v2013_v41, %v2347_v26  ;;  %v648_v43 = vpop.f32.mrb[5].mxu0 }
 0x102   : > { %v649_v44 = vadd.f32 %v2347_v26, %v648_v43  ;;  %v2014_v45 = vpop.f32.mrb[6].mxu0  ;;  %2055 = vmatprep.mubr.bf16.mxu0 %v791_v40 }
 0x103   : > { %v765_v46 = vmax.f32 %v657_v42, 0.0  ;;  %v660_v47 = vadd.f32 %v2014_v45, %v2347_v26  ;;  %v651_v48 = vpop.f32.mrb[7].mxu0  ;;  %2056 = vmatmul.mubr.bf16.vlgmr.msra.gmra.mrb[32].mxu0 %v792_v39 }
 0x104   : > { %v652_v49 = vadd.f32 %v2347_v26, %v651_v48  ;;  %v763_v51 = vmax.f32 %v649_v44, 0.0 }
 0x105   : > { %v766_v50 = vmax.f32 %v660_v47, 0.0 }
 0x106   : > { %v764_v52 = vmax.f32 %v652_v49, 0.0 }
 0x107   : > { %v794_v53 = vpack.c.bf16 %v766_v50, %v765_v46 }
 0x108   : > { %v2017_v54 = vpop.f32.mrb[8].mxu0  ;;  %v793_v55 = vpack.c.bf16 %v764_v52, %v763_v51 }
 0x109   : > { %v673_v56 = vadd.f32 %v2017_v54, %v2347_v26  ;;  %v664_v57 = vpop.f32.mrb[9].mxu0 }
 0x10a   : > { %v665_v58 = vadd.f32 %v2347_v26, %v664_v57  ;;  %v2018_v59 = vpop.f32.mrb[10].mxu0  ;;  %2059 = vmatprep.mubr.bf16.mxu1 %v793_v55 }
 0x10b   : > { %v769_v60 = vmax.f32 %v673_v56, 0.0  ;;  %v676_v61 = vadd.f32 %v2018_v59, %v2347_v26  ;;  %v667_v62 = vpop.f32.mrb[11].mxu0  ;;  %2060 = vmatmul.mubr.bf16.vlgmr.msra.gmra.mrb[0].mxu1 %v794_v53 }
 0x10c   : > { %v668_v63 = vadd.f32 %v2347_v26, %v667_v62  ;;  %v767_v1 = vmax.f32 %v665_v58, 0.0 }
 0x10d   : > { %v770_v0 = vmax.f32 %v676_v61, 0.0 }
 0x10e   : > { %v768_v2 = vmax.f32 %v668_v63, 0.0 }
 0x10f   : > { %v796_v3 = vpack.c.bf16 %v770_v0, %v769_v60 }
 0x110   : > { %v795_v4 = vpack.c.bf16 %v768_v2, %v767_v1  ;;  %v2021_v5 = vpop.f32.mrb[12].mxu0 }
 0x111   : > { %v689_v6 = vadd.f32 %v2021_v5, %v2347_v26  ;;  %v680_v7 = vpop.f32.mrb[13].mxu0 }
 0x112   : > { %v681_v8 = vadd.f32 %v2347_v26, %v680_v7  ;;  %v2022_v9 = vpop.f32.mrb[14].mxu0  ;;  %2063 = vmatprep.mubr.bf16.mxu1 %v795_v4 }
 0x113   : > { %v773_v10 = vmax.f32 %v689_v6, 0.0  ;;  %v692_v11 = vadd.f32 %v2022_v9, %v2347_v26  ;;  %v683_v12 = vpop.f32.mrb[15].mxu0  ;;  %2064 = vmatmul.mubr.bf16.gmra.mrb[4].mxu1 %v796_v3 }
 0x114   : > { %v684_v13 = vadd.f32 %v2347_v26, %v683_v12  ;;  %v771_v15 = vmax.f32 %v681_v8, 0.0  ;;  %v2385_v12 = vld [vmem:[%s406_s13] ss:$0 sm:$0xff] }
 0x115   : > { %v774_v14 = vmax.f32 %v692_v11, 0.0 }
 0x116   : > { %v772_v16 = vmax.f32 %v684_v13, 0.0 }
 0x117   : > { %v798_v17 = vpack.c.bf16 %v774_v14, %v773_v10 }
 0x118   : > { %v797_v18 = vpack.c.bf16 %v772_v16, %v771_v15  ;;  %v2025_v19 = vpop.f32.mrb[16].mxu0 }
 0x119   : > { %v705_v20 = vadd.f32 %v2025_v19, %v2347_v26  ;;  %v696_v21 = vpop.f32.mrb[17].mxu0 }
 0x11a   : > { %v697_v22 = vadd.f32 %v2347_v26, %v696_v21  ;;  %v2026_v23 = vpop.f32.mrb[18].mxu0  ;;  %2067 = vmatprep.mubr.bf16.mxu1 %v797_v18 }
 0x11b   : > { %v777_v24 = vmax.f32 %v705_v20, 0.0  ;;  %v708_v25 = vadd.f32 %v2026_v23, %v2347_v26  ;;  %v699_v27 = vpop.f32.mrb[19].mxu0  ;;  %2068 = vmatmul.mubr.bf16.gmra.mrb[8].mxu1 %v798_v17 }
 0x11c   : > { %v700_v28 = vadd.f32 %v2347_v26, %v699_v27  ;;  %v775_v30 = vmax.f32 %v697_v22, 0.0 }
 0x11d   : > { %v778_v29 = vmax.f32 %v708_v25, 0.0 }
 0x11e   : > { %v776_v31 = vmax.f32 %v700_v28, 0.0 }
 0x11f   : > { %v800_v32 = vpack.c.bf16 %v778_v29, %v777_v24 }
 0x120   : > { %v799_v33 = vpack.c.bf16 %v776_v31, %v775_v30  ;;  %v2029_v34 = vpop.f32.mrb[20].mxu0 }
 0x121   : > { %v721_v35 = vadd.f32 %v2029_v34, %v2347_v26  ;;  %v712_v36 = vpop.f32.mrb[21].mxu0 }
 0x122   : > { %v713_v37 = vadd.f32 %v2347_v26, %v712_v36  ;;  %v2030_v38 = vpop.f32.mrb[22].mxu0  ;;  %2071 = vmatprep.mubr.bf16.mxu1 %v799_v33 }
 0x123   : > { %v781_v39 = vmax.f32 %v721_v35, 0.0  ;;  %v724_v40 = vadd.f32 %v2030_v38, %v2347_v26  ;;  %v715_v41 = vpop.f32.mrb[23].mxu0  ;;  %2072 = vmatmul.mubr.bf16.gmra.mrb[12].mxu1 %v800_v32 }
 0x124   : > { %v716_v42 = vadd.f32 %v2347_v26, %v715_v41  ;;  %v779_v44 = vmax.f32 %v713_v37, 0.0 }
 0x125   : > { %v782_v43 = vmax.f32 %v724_v40, 0.0 }
 0x126   : > { %v780_v45 = vmax.f32 %v716_v42, 0.0 }
 0x127   : > { %v802_v46 = vpack.c.bf16 %v782_v43, %v781_v39 }
 0x128   : > { %v801_v47 = vpack.c.bf16 %v780_v45, %v779_v44  ;;  %v2033_v48 = vpop.f32.mrb[24].mxu0 }
 0x129   : > { %v737_v49 = vadd.f32 %v2033_v48, %v2347_v26  ;;  %v728_v50 = vpop.f32.mrb[25].mxu0 }
 0x12a   : > { %v729_v51 = vadd.f32 %v2347_v26, %v728_v50  ;;  %v2034_v52 = vpop.f32.mrb[26].mxu0  ;;  %2075 = vmatprep.mubr.bf16.mxu1 %v801_v47 }
 0x12b   : > { %v785_v53 = vmax.f32 %v737_v49, 0.0  ;;  %v740_v54 = vadd.f32 %v2034_v52, %v2347_v26  ;;  %v731_v55 = vpop.f32.mrb[27].mxu0  ;;  %2076 = vmatmul.mubr.bf16.gmra.mrb[16].mxu1 %v802_v46 }
 0x12c   : > { %v732_v56 = vadd.f32 %v2347_v26, %v731_v55  ;;  %v783_v58 = vmax.f32 %v729_v51, 0.0 }
 0x12d   : > { %v786_v57 = vmax.f32 %v740_v54, 0.0 }
 0x12e   : > { %v784_v59 = vmax.f32 %v732_v56, 0.0 }
 0x12f   : > { %v804_v60 = vpack.c.bf16 %v786_v57, %v785_v53 }
 0x130   : > { %v803_v61 = vpack.c.bf16 %v784_v59, %v783_v58  ;;  %v2037_v62 = vpop.f32.mrb[28].mxu0 }
 0x131   : > { %v753_v63 = vadd.f32 %v2037_v62, %v2347_v26  ;;  %v744_v0 = vpop.f32.mrb[29].mxu0 }
 0x132   : > { %v745_v1 = vadd.f32 %v2347_v26, %v744_v0  ;;  %v2038_v2 = vpop.f32.mrb[30].mxu0  ;;  %2079 = vmatprep.mubr.bf16.mxu1 %v803_v61 }
 0x133   : > { %v789_v3 = vmax.f32 %v753_v63, 0.0  ;;  %v756_v4 = vadd.f32 %v2038_v2, %v2347_v26  ;;  %v747_v5 = vpop.f32.mrb[31].mxu0  ;;  %2080 = vmatmul.mubr.bf16.gmra.mrb[20].mxu1 %v804_v60 }
 0x134   : > { %v748_v6 = vadd.f32 %v2347_v26, %v747_v5  ;;  %v787_v8 = vmax.f32 %v745_v1, 0.0 }
 0x135   : > { %v790_v7 = vmax.f32 %v756_v4, 0.0 }
 0x136   : > { %v788_v9 = vmax.f32 %v748_v6, 0.0 }
 0x137   : > { %v806_v10 = vpack.c.bf16 %v790_v7, %v789_v3 }
 0x138   : > { %v805_v11 = vpack.c.bf16 %v788_v9, %v787_v8 }
 0x13a   : > { %2083 = vmatprep.mubr.bf16.mxu1 %v805_v11 }
 0x13b   : > { %2084 = vmatmul.mubr.bf16.gmra.mrb[24].mxu1 %v806_v10 }
 0x1d6   : > { %v2057_v13 = vpop.f32.mrb[32].mxu0 }
 0x1d7   : > { %v2388_v14 = vadd.f32 %v2057_v13, %v2385_v12  ;;  %v912_v26 = vpop.f32.mrb[33].mxu0 }
 0x1d8   : > { %v2391_v15 = vadd.f32 %v2385_v12, %v912_v26  ;;  %v2058_v16 = vpop.f32.mrb[34].mxu0 }
 0x1d9   : > { %1043 = vadd.xlane.f32.xlu1 %v2388_v14  ;;  %v915_v17 = vpop.f32.mrb[35].mxu0  ;;  %v2396_v18 = vadd.f32 %v2058_v16, %v2385_v12 }
 0x1da   : > { %1039 = vadd.xlane.f32.xlu0 %v2391_v15  ;;  %v2399_v19 = vadd.f32 %v2385_v12, %v915_v17 }
 0x1dd   : > { %1045 = vadd.xlane.f32.xlu1 %v2396_v18 }
 0x1de   : > { %v2061_v20 = vpop.f32.mrb[0].mxu1  ;;  %1041 = vadd.xlane.f32.xlu0 %v2399_v19 }
 0x1df   : > { %v2404_v21 = vadd.f32 %v2061_v20, %v2385_v12  ;;  %v928_v22 = vpop.f32.mrb[1].mxu1 }
 0x1e0   : > { %v2062_v23 = vpop.f32.mrb[2].mxu1  ;;  %v2412_v27 = vadd.f32 %v2385_v12, %v928_v22 }
 0x1e1   : > { %v2407_v24 = vadd.f32 %v2062_v23, %v2385_v12  ;;  %v931_v25 = vpop.f32.mrb[3].mxu1 }
 0x1e2   : > { %1051 = vadd.xlane.f32.xlu0 %v2404_v21  ;;  %v2415_v28 = vadd.f32 %v2385_v12, %v931_v25 }
 0x1e3   : > { %1053 = vadd.xlane.f32.xlu1 %v2407_v24 }
 0x1e6   : > { %v2065_v29 = vpop.f32.mrb[4].mxu1  ;;  %1047 = vadd.xlane.f32.xlu0 %v2412_v27 }
 0x1e7   : > { %v2419_v30 = vadd.f32 %v2065_v29, %v2385_v12  ;;  %v944_v31 = vpop.f32.mrb[5].mxu1  ;;  %1049 = vadd.xlane.f32.xlu1 %v2415_v28 }
 0x1e8   : > { %v2066_v32 = vpop.f32.mrb[6].mxu1  ;;  %v2428_v35 = vadd.f32 %v2385_v12, %v944_v31 }
 0x1e9   : > { %v2423_v33 = vadd.f32 %v2066_v32, %v2385_v12  ;;  %v947_v34 = vpop.f32.mrb[7].mxu1 }
 0x1ea   : > { %1059 = vadd.xlane.f32.xlu0 %v2419_v30  ;;  %v2431_v36 = vadd.f32 %v2385_v12, %v947_v34 }
 0x1eb   : > { %1061 = vadd.xlane.f32.xlu1 %v2423_v33 }
 0x1ee   : > { %v2069_v37 = vpop.f32.mrb[8].mxu1  ;;  %1055 = vadd.xlane.f32.xlu0 %v2428_v35 }
 0x1ef   : > { %v2435_v38 = vadd.f32 %v2069_v37, %v2385_v12  ;;  %v960_v39 = vpop.f32.mrb[9].mxu1  ;;  %1057 = vadd.xlane.f32.xlu1 %v2431_v36 }
 0x1f0   : > { %v2070_v40 = vpop.f32.mrb[10].mxu1  ;;  %v2444_v43 = vadd.f32 %v2385_v12, %v960_v39 }
 0x1f1   : > { %v2439_v41 = vadd.f32 %v2070_v40, %v2385_v12  ;;  %v963_v42 = vpop.f32.mrb[11].mxu1 }
 0x1f2   : > { %1067 = vadd.xlane.f32.xlu0 %v2435_v38  ;;  %v2447_v44 = vadd.f32 %v2385_v12, %v963_v42 }
 0x1f3   : > { %1069 = vadd.xlane.f32.xlu1 %v2439_v41 }
 0x1f6   : > { %v2073_v45 = vpop.f32.mrb[12].mxu1  ;;  %1063 = vadd.xlane.f32.xlu0 %v2444_v43 }
 0x1f7   : > { %v2451_v46 = vadd.f32 %v2073_v45, %v2385_v12  ;;  %v976_v47 = vpop.f32.mrb[13].mxu1  ;;  %1065 = vadd.xlane.f32.xlu1 %v2447_v44 }
 0x1f8   : > { %v2074_v48 = vpop.f32.mrb[14].mxu1  ;;  %v2460_v51 = vadd.f32 %v2385_v12, %v976_v47 }
 0x1f9   : > { %v2455_v49 = vadd.f32 %v2074_v48, %v2385_v12  ;;  %v979_v50 = vpop.f32.mrb[15].mxu1 }
 0x1fa   : > { %1075 = vadd.xlane.f32.xlu0 %v2451_v46  ;;  %v2463_v52 = vadd.f32 %v2385_v12, %v979_v50 }
 0x1fb   : > { %1077 = vadd.xlane.f32.xlu1 %v2455_v49 }
 0x1fe   : > { %v2077_v53 = vpop.f32.mrb[16].mxu1  ;;  %1071 = vadd.xlane.f32.xlu0 %v2460_v51 }
 0x1ff   : > { %v2467_v54 = vadd.f32 %v2077_v53, %v2385_v12  ;;  %v992_v55 = vpop.f32.mrb[17].mxu1  ;;  %1073 = vadd.xlane.f32.xlu1 %v2463_v52 }
 0x200   : > { %v2078_v56 = vpop.f32.mrb[18].mxu1  ;;  %v2476_v59 = vadd.f32 %v2385_v12, %v992_v55 }
 0x201   : > { %v2471_v57 = vadd.f32 %v2078_v56, %v2385_v12  ;;  %v995_v58 = vpop.f32.mrb[19].mxu1 }
 0x202   : > { %1083 = vadd.xlane.f32.xlu0 %v2467_v54  ;;  %v2479_v60 = vadd.f32 %v2385_v12, %v995_v58 }
 0x203   : > { %1085 = vadd.xlane.f32.xlu1 %v2471_v57 }
 0x206   : > { %v2081_v61 = vpop.f32.mrb[20].mxu1  ;;  %1079 = vadd.xlane.f32.xlu0 %v2476_v59 }
 0x207   : > { %v2483_v62 = vadd.f32 %v2081_v61, %v2385_v12  ;;  %v1008_v63 = vpop.f32.mrb[21].mxu1  ;;  %1081 = vadd.xlane.f32.xlu1 %v2479_v60 }
 0x208   : > { %v2082_v0 = vpop.f32.mrb[22].mxu1  ;;  %v2492_v3 = vadd.f32 %v2385_v12, %v1008_v63 }
 0x209   : > { %v2487_v1 = vadd.f32 %v2082_v0, %v2385_v12  ;;  %v1011_v2 = vpop.f32.mrb[23].mxu1 }
 0x20a   : > { %1091 = vadd.xlane.f32.xlu0 %v2483_v62  ;;  %v2495_v4 = vadd.f32 %v2385_v12, %v1011_v2 }
 0x20b   : > { %1093 = vadd.xlane.f32.xlu1 %v2487_v1 }
 0x20e   : > { %v2085_v5 = vpop.f32.mrb[24].mxu1  ;;  %1087 = vadd.xlane.f32.xlu0 %v2492_v3 }
 0x20f   : > { %v1024_v6 = vpop.f32.mrb[25].mxu1  ;;  %1089 = vadd.xlane.f32.xlu1 %v2495_v4  ;;  %v2507_v11 = vadd.f32 %v2085_v5, %v2385_v12 }
 0x210   : > { %v2500_v7 = vadd.f32 %v2385_v12, %v1024_v6  ;;  %v2086_v8 = vpop.f32.mrb[26].mxu1 }
 0x211   : > { %v1027_v9 = vpop.f32.mrb[27].mxu1  ;;  %v2511_v13 = vadd.f32 %v2086_v8, %v2385_v12 }
 0x212   : > { %v2503_v10 = vadd.f32 %v2385_v12, %v1027_v9  ;;  %1095 = vadd.xlane.f32.xlu0 %v2500_v7 }
 0x214   : > { %1097 = vadd.xlane.f32.xlu1 %v2503_v10 }
 0x216   : > { %1099 = vadd.xlane.f32.xlu0 %v2507_v11 }
 0x218   : > { %1101 = vadd.xlane.f32.xlu1 %v2511_v13 }
 0x266   : > { %v1044_v26 = vpop.xlane.xlu1 %1043 }
 0x267   : > { %v1106_v16 = vmul.f32 0.0078125, %v1044_v26  ;;  %v1040_v17 = vpop.xlane.xlu0 %1039 }
 0x268   : > { %v1104_v20 = vmul.f32 0.0078125, %v1040_v17 }
 0x269   : > { %v2516_v22 = vsub.f32 %v2388_v14, %v1106_v16 }
 0x26a   : > { %v1046_v23 = vpop.xlane.xlu1 %1045  ;;  %v2519_v25 = vsub.f32 %v2391_v15, %v1104_v20 }
 0x26b   : > { %v1107_v29 = vmul.f32 0.0078125, %v1046_v23  ;;  %v1042_v31 = vpop.xlane.xlu0 %1041  ;;  %v1170_v12 = vmul.f32 %v2516_v22, %v2516_v22 }
 0x26c   : > { %v1105_v32 = vmul.f32 0.0078125, %v1042_v31  ;;  %v1168_v15 = vmul.f32 %v2519_v25, %v2519_v25 }
 0x26d   : > { %v2524_v34 = vsub.f32 %v2396_v18, %v1107_v29  ;;  %1204 = vadd.xlane.f32.xlu0 %v1170_v12 }
 0x26e   : > { %v2527_v37 = vsub.f32 %v2399_v19, %v1105_v32 }
 0x26f   : > { %v1052_v39 = vpop.xlane.xlu0 %1051  ;;  %v1171_v14 = vmul.f32 %v2524_v34, %v2524_v34 }
 0x270   : > { %v1110_v40 = vmul.f32 0.0078125, %v1052_v39  ;;  %v1054_v42 = vpop.xlane.xlu1 %1053  ;;  %v1169_v48 = vmul.f32 %v2527_v37, %v2527_v37 }
 0x271   : > { %v1111_v45 = vmul.f32 0.0078125, %v1054_v42  ;;  %1206 = vadd.xlane.f32.xlu1 %v1171_v14  ;;  %1200 = vadd.xlane.f32.xlu0 %v1168_v15 }
 0x272   : > { %v2534_v47 = vsub.f32 %v2404_v21, %v1110_v40 }
 0x273   : > { %v2537_v18 = vsub.f32 %v2407_v24, %v1111_v45  ;;  %v1048_v19 = vpop.xlane.xlu0 %1047 }
 0x274   : > { %v1108_v50 = vmul.f32 0.0078125, %v1048_v19  ;;  %v1050_v53 = vpop.xlane.xlu1 %1049  ;;  %v1174_v55 = vmul.f32 %v2534_v47, %v2534_v47 }
 0x275   : > { %v1109_v56 = vmul.f32 0.0078125, %v1050_v53  ;;  %1202 = vadd.xlane.f32.xlu1 %v1169_v48  ;;  %v1175_v61 = vmul.f32 %v2537_v18, %v2537_v18 }
 0x276   : > { %v2544_v58 = vsub.f32 %v2412_v27, %v1108_v50  ;;  %1212 = vadd.xlane.f32.xlu0 %v1174_v55 }
 0x277   : > { %v2547_v21 = vsub.f32 %v2415_v28, %v1109_v56  ;;  %v1060_v24 = vpop.xlane.xlu0 %1059 }
 0x278   : > { %v1114_v63 = vmul.f32 0.0078125, %v1060_v24  ;;  %v1062_v0 = vpop.xlane.xlu1 %1061  ;;  %v1172_v2 = vmul.f32 %v2544_v58, %v2544_v58 }
 0x279   : > { %v1115_v5 = vmul.f32 0.0078125, %v1062_v0  ;;  %1214 = vadd.xlane.f32.xlu1 %v1175_v61  ;;  %v1173_v8 = vmul.f32 %v2547_v21, %v2547_v21 }
 0x27a   : > { %v2554_v6 = vsub.f32 %v2419_v30, %v1114_v63  ;;  %1208 = vadd.xlane.f32.xlu0 %v1172_v2 }
 0x27b   : > { %v2557_v27 = vsub.f32 %v2423_v33, %v1115_v5  ;;  %v1056_v28 = vpop.xlane.xlu0 %1055 }
 0x27c   : > { %v1112_v9 = vmul.f32 0.0078125, %v1056_v28  ;;  %v1058_v26 = vpop.xlane.xlu1 %1057  ;;  %v1178_v16 = vmul.f32 %v2554_v6, %v2554_v6 }
 0x27d   : > { %v1113_v17 = vmul.f32 0.0078125, %v1058_v26  ;;  %1210 = vadd.xlane.f32.xlu1 %v1173_v8  ;;  %v1179_v23 = vmul.f32 %v2557_v27, %v2557_v27 }
 0x27e   : > { %v2564_v20 = vsub.f32 %v2428_v35, %v1112_v9  ;;  %1220 = vadd.xlane.f32.xlu0 %v1178_v16 }
 0x27f   : > { %v2567_v30 = vsub.f32 %v2431_v36, %v1113_v17  ;;  %v1068_v33 = vpop.xlane.xlu0 %1067 }
 0x280   : > { %v1118_v29 = vmul.f32 0.0078125, %v1068_v33  ;;  %v1070_v31 = vpop.xlane.xlu1 %1069  ;;  %v1176_v12 = vmul.f32 %v2564_v20, %v2564_v20 }
 0x281   : > { %v1119_v32 = vmul.f32 0.0078125, %v1070_v31  ;;  %1222 = vadd.xlane.f32.xlu1 %v1179_v23  ;;  %v1177_v14 = vmul.f32 %v2567_v30, %v2567_v30 }
 0x282   : > { %v2574_v39 = vsub.f32 %v2435_v38, %v1118_v29  ;;  %1216 = vadd.xlane.f32.xlu0 %v1176_v12 }
 0x283   : > { %v2577_v35 = vsub.f32 %v2439_v41, %v1119_v32  ;;  %v1064_v36 = vpop.xlane.xlu0 %1063 }
 0x284   : > { %v1116_v15 = vmul.f32 0.0078125, %v1064_v36  ;;  %v1066_v40 = vpop.xlane.xlu1 %1065  ;;  %v1182_v42 = vmul.f32 %v2574_v39, %v2574_v39 }
 0x285   : > { %v1117_v45 = vmul.f32 0.0078125, %v1066_v40  ;;  %1218 = vadd.xlane.f32.xlu1 %v1177_v14  ;;  %v1183_v48 = vmul.f32 %v2577_v35, %v2577_v35 }
 0x286   : > { %v2584_v19 = vsub.f32 %v2444_v43, %v1116_v15  ;;  %1228 = vadd.xlane.f32.xlu0 %v1182_v42 }
 0x287   : > { %v2587_v38 = vsub.f32 %v2447_v44, %v1117_v45  ;;  %v1076_v41 = vpop.xlane.xlu0 %1075 }
 0x288   : > { %v1122_v50 = vmul.f32 0.0078125, %v1076_v41  ;;  %v1078_v53 = vpop.xlane.xlu1 %1077  ;;  %v1180_v55 = vmul.f32 %v2584_v19, %v2584_v19 }
 0x289   : > { %v1123_v56 = vmul.f32 0.0078125, %v1078_v53  ;;  %1230 = vadd.xlane.f32.xlu1 %v1183_v48  ;;  %v1181_v61 = vmul.f32 %v2587_v38, %v2587_v38 }
 0x28a   : > { %v2594_v24 = vsub.f32 %v2451_v46, %v1122_v50  ;;  %1224 = vadd.xlane.f32.xlu0 %v1180_v55 }
 0x28b   : > { %v2597_v43 = vsub.f32 %v2455_v49, %v1123_v56  ;;  %v1072_v44 = vpop.xlane.xlu0 %1071 }
 0x28c   : > { %v1120_v63 = vmul.f32 0.0078125, %v1072_v44  ;;  %v1074_v0 = vpop.xlane.xlu1 %1073  ;;  %v1186_v2 = vmul.f32 %v2594_v24, %v2594_v24 }
 0x28d   : > { %v1121_v5 = vmul.f32 0.0078125, %v1074_v0  ;;  %1226 = vadd.xlane.f32.xlu1 %v1181_v61  ;;  %v1187_v8 = vmul.f32 %v2597_v43, %v2597_v43 }
 0x28e   : > { %v2604_v28 = vsub.f32 %v2460_v51, %v1120_v63  ;;  %1236 = vadd.xlane.f32.xlu0 %v1186_v2 }
 0x28f   : > { %v2607_v46 = vsub.f32 %v2463_v52, %v1121_v5  ;;  %v1084_v49 = vpop.xlane.xlu0 %1083 }
 0x290   : > { %v1126_v9 = vmul.f32 0.0078125, %v1084_v49  ;;  %v1086_v26 = vpop.xlane.xlu1 %1085  ;;  %v1184_v16 = vmul.f32 %v2604_v28, %v2604_v28 }
 0x291   : > { %v1127_v17 = vmul.f32 0.0078125, %v1086_v26  ;;  %1238 = vadd.xlane.f32.xlu1 %v1187_v8  ;;  %v1185_v23 = vmul.f32 %v2607_v46, %v2607_v46 }
 0x292   : > { %v2614_v33 = vsub.f32 %v2467_v54, %v1126_v9  ;;  %1232 = vadd.xlane.f32.xlu0 %v1184_v16 }
 0x293   : > { %v2617_v51 = vsub.f32 %v2471_v57, %v1127_v17  ;;  %v1080_v52 = vpop.xlane.xlu0 %1079 }
 0x294   : > { %v1124_v29 = vmul.f32 0.0078125, %v1080_v52  ;;  %v1082_v31 = vpop.xlane.xlu1 %1081  ;;  %v1190_v12 = vmul.f32 %v2614_v33, %v2614_v33 }
 0x295   : > { %v1125_v32 = vmul.f32 0.0078125, %v1082_v31  ;;  %1234 = vadd.xlane.f32.xlu1 %v1185_v23  ;;  %v1191_v14 = vmul.f32 %v2617_v51, %v2617_v51 }
 0x296   : > { %v2624_v36 = vsub.f32 %v2476_v59, %v1124_v29  ;;  %1244 = vadd.xlane.f32.xlu0 %v1190_v12 }
 0x297   : > { %v2627_v54 = vsub.f32 %v2479_v60, %v1125_v32  ;;  %v1092_v57 = vpop.xlane.xlu0 %1091 }
 0x298   : > { %v1130_v15 = vmul.f32 0.0078125, %v1092_v57  ;;  %v1094_v40 = vpop.xlane.xlu1 %1093  ;;  %v1188_v42 = vmul.f32 %v2624_v36, %v2624_v36 }
 0x299   : > { %v1131_v45 = vmul.f32 0.0078125, %v1094_v40  ;;  %1246 = vadd.xlane.f32.xlu1 %v1191_v14  ;;  %v1189_v48 = vmul.f32 %v2627_v54, %v2627_v54 }
 0x29a   : > { %v2634_v41 = vsub.f32 %v2483_v62, %v1130_v15  ;;  %1240 = vadd.xlane.f32.xlu0 %v1188_v42 }
 0x29b   : > { %v2637_v59 = vsub.f32 %v2487_v1, %v1131_v45  ;;  %v1088_v60 = vpop.xlane.xlu0 %1087 }
 0x29c   : > { %v1128_v50 = vmul.f32 0.0078125, %v1088_v60  ;;  %v1090_v53 = vpop.xlane.xlu1 %1089  ;;  %v1194_v55 = vmul.f32 %v2634_v41, %v2634_v41 }
 0x29d   : > { %v1129_v56 = vmul.f32 0.0078125, %v1090_v53  ;;  %1242 = vadd.xlane.f32.xlu1 %v1189_v48  ;;  %v1195_v61 = vmul.f32 %v2637_v59, %v2637_v59 }
 0x29e   : > { %v2644_v44 = vsub.f32 %v2492_v3, %v1128_v50  ;;  %1252 = vadd.xlane.f32.xlu0 %v1194_v55 }
 0x29f   : > { %v2647_v62 = vsub.f32 %v2495_v4, %v1129_v56  ;;  %v1096_v1 = vpop.xlane.xlu0 %1095 }
 0x2a0   : > { %v1132_v63 = vmul.f32 0.0078125, %v1096_v1  ;;  %v1192_v0 = vmul.f32 %v2644_v44, %v2644_v44 }
 0x2a1   : > { %v1098_v2 = vpop.xlane.xlu1 %1097  ;;  %1254 = vadd.xlane.f32.xlu1 %v1195_v61  ;;  %v1193_v4 = vmul.f32 %v2647_v62, %v2647_v62 }
 0x2a2   : > { %v2654_v5 = vsub.f32 %v2500_v7, %v1132_v63  ;;  %v1133_v49 = vmul.f32 0.0078125, %v1098_v2  ;;  %1248 = vadd.xlane.f32.xlu0 %v1192_v0  ;;  %v2680_v2 = vld [vmem:[%s411_s18] ss:$0 sm:$0xff] }
 0x2a3   : > { %v1100_v3 = vpop.xlane.xlu0 %1099 }
 0x2a4   : > { %v2659_v8 = vsub.f32 %v2503_v10, %v1133_v49  ;;  %v1134_v9 = vmul.f32 0.0078125, %v1100_v3  ;;  %v1196_v26 = vmul.f32 %v2654_v5, %v2654_v5 }
 0x2a5   : > { %v1102_v16 = vpop.xlane.xlu1 %1101  ;;  %1250 = vadd.xlane.f32.xlu1 %v1193_v4 }
 0x2a6   : > { %v2664_v7 = vsub.f32 %v2507_v11, %v1134_v9  ;;  %v1135_v17 = vmul.f32 0.0078125, %v1102_v16  ;;  %1256 = vadd.xlane.f32.xlu0 %v1196_v26  ;;  %v1197_v52 = vmul.f32 %v2659_v8, %v2659_v8 }
 0x2a8   : > { %v2669_v23 = vsub.f32 %v2511_v13, %v1135_v17  ;;  %v1198_v10 = vmul.f32 %v2664_v7, %v2664_v7 }
 0x2a9   : > { %1258 = vadd.xlane.f32.xlu1 %v1197_v52 }
 0x2aa   : > { %1260 = vadd.xlane.f32.xlu0 %v1198_v10  ;;  %v1199_v29 = vmul.f32 %v2669_v23, %v2669_v23 }
 0x2ad   : > { %1262 = vadd.xlane.f32.xlu1 %v1199_v29 }
 0x2fa   : > { %v1205_v11 = vpop.xlane.xlu0 %1204 }
 0x2fb   : > { %v1266_v31 = vmul.f32 0.0078125, %v1205_v11  ;;  %v2687_v11 = vld [vmem:[%s416_s21] ss:$0 sm:$0xff] }
 0x2fd   : > { %v1298_v12 = vadd.f32 1e-05, %v1266_v31 }
 0x2fe   : > { %v1207_v32 = vpop.xlane.xlu1 %1206  ;;  %v1201_v57 = vpop.xlane.xlu0 %1200 }
 0x2ff   : > { %2137 = vrsqrt.f32 %v1298_v12  ;;  %v1267_v13 = vmul.f32 0.0078125, %v1207_v32  ;;  %v1264_v14 = vmul.f32 0.0078125, %v1201_v57 }
 0x301   : > { %v1299_v15 = vadd.f32 1e-05, %v1267_v13  ;;  %v1296_v40 = vadd.f32 1e-05, %v1264_v14 }
 0x302   : > { %v1203_v42 = vpop.xlane.xlu1 %1202 }
 0x303   : > { %2139 = vrsqrt.f32 %v1299_v15  ;;  %v1265_v45 = vmul.f32 0.0078125, %v1203_v42  ;;  %v1213_v60 = vpop.xlane.xlu0 %1212 }
 0x304   : > { %2141 = vrsqrt.f32 %v1296_v40  ;;  %v1270_v48 = vmul.f32 0.0078125, %v1213_v60 }
 0x305   : > { %v1297_v50 = vadd.f32 1e-05, %v1265_v45 }
 0x306   : > { %v1302_v53 = vadd.f32 1e-05, %v1270_v48  ;;  %v1215_v55 = vpop.xlane.xlu1 %1214 }
 0x307   : > { %2143 = vrsqrt.f32 %v1297_v50  ;;  %v1271_v56 = vmul.f32 0.0078125, %v1215_v55  ;;  %v1209_v1 = vpop.xlane.xlu0 %1208 }
 0x308   : > { %2145 = vrsqrt.f32 %v1302_v53  ;;  %v1268_v61 = vmul.f32 0.0078125, %v1209_v1 }
 0x309   : > { %v2138_v63 = vpop.eup %2137  ;;  %v1303_v0 = vadd.f32 1e-05, %v1271_v56 }
 0x30a   : > { %v1362_v49 = vmul.f32 %v2138_v63, %v2516_v22  ;;  %v1300_v3 = vadd.f32 1e-05, %v1268_v61  ;;  %v1211_v4 = vpop.xlane.xlu1 %1210 }
 0x30b   : > { %2147 = vrsqrt.f32 %v1303_v0  ;;  %v1269_v9 = vmul.f32 0.0078125, %v1211_v4  ;;  %v1221_v26 = vpop.xlane.xlu0 %1220 }
 0x30c   : > { %2149 = vrsqrt.f32 %v1300_v3  ;;  %v1274_v16 = vmul.f32 0.0078125, %v1221_v26  ;;  %v1401_v52 = vmul.f32 %v2680_v2, %v1362_v49 }
 0x30d   : > { %v2140_v17 = vpop.eup %2139  ;;  %v1301_v10 = vadd.f32 1e-05, %v1269_v9 }
 0x30e   : > { %v2142_v29 = vpop.eup %2141  ;;  %v1363_v22 = vmul.f32 %v2140_v17, %v2524_v34  ;;  %v1306_v31 = vadd.f32 1e-05, %v1274_v16  ;;  %v1223_v12 = vpop.xlane.xlu1 %1222  ;;  %v1440_v42 = vadd.f32 %v2687_v11, %v1401_v52 }
 0x30f   : > { %v1360_v32 = vmul.f32 %v2142_v29, %v2519_v25  ;;  %2151 = vrsqrt.f32 %v1301_v10  ;;  %v1275_v57 = vmul.f32 0.0078125, %v1223_v12  ;;  %v1217_v13 = vpop.xlane.xlu0 %1216 }
 0x310   : > { %v1402_v14 = vmul.f32 %v2680_v2, %v1363_v22  ;;  %2153 = vrsqrt.f32 %v1306_v31  ;;  %v1272_v15 = vmul.f32 0.0078125, %v1217_v13 }
 0x311   : > { %v2144_v40 = vpop.eup %2143  ;;  %v1307_v45 = vadd.f32 1e-05, %v1275_v57  ;;  %v1399_v34 = vmul.f32 %v2680_v2, %v1360_v32 }
 0x312   : > { %v2146_v60 = vpop.eup %2145  ;;  %v1441_v48 = vadd.f32 %v2687_v11, %v1402_v14  ;;  %v1361_v50 = vmul.f32 %v2144_v40, %v2527_v37  ;;  %v1304_v25 = vadd.f32 1e-05, %v1272_v15  ;;  %v1219_v53 = vpop.xlane.xlu1 %1218 }
 0x313   : > { %v1366_v55 = vmul.f32 %v2146_v60, %v2534_v47  ;;  %2155 = vrsqrt.f32 %v1307_v45  ;;  %v1273_v56 = vmul.f32 0.0078125, %v1219_v53  ;;  %v1229_v1 = vpop.xlane.xlu0 %1228  ;;  %v1438_v9 = vadd.f32 %v2687_v11, %v1399_v34 }
 0x314   : > { %v1877_v61 = vpack.c.bf16 %v1441_v48, %v1440_v42  ;;  %v1400_v63 = vmul.f32 %v2680_v2, %v1361_v50  ;;  %2157 = vrsqrt.f32 %v1304_v25  ;;  %v1278_v0 = vmul.f32 0.0078125, %v1229_v1 }
 0x315   : > { %v2148_v37 = vpop.eup %2147  ;;  %v1405_v49 = vmul.f32 %v2680_v2, %v1366_v55  ;;  %v1305_v3 = vadd.f32 1e-05, %v1273_v56 }
 0x316   : > { %v2150_v4 = vpop.eup %2149  ;;  %1949 = vst [vmem:[%s2701_s24 + $0x8] sm:$0xff] %v1877_v61   ;;  %v1439_v26 = vadd.f32 %v2687_v11, %v1400_v63  ;;  %v1367_v47 = vmul.f32 %v2148_v37, %v2537_v18  ;;  %v1310_v16 = vadd.f32 1e-05, %v1278_v0  ;;  %v1231_v17 = vpop.xlane.xlu1 %1230 }
 0x317   : > { %v1364_v52 = vmul.f32 %v2150_v4, %v2544_v58  ;;  %2159 = vrsqrt.f32 %v1305_v3  ;;  %v1279_v10 = vmul.f32 0.0078125, %v1231_v17  ;;  %v1225_v29 = vpop.xlane.xlu0 %1224  ;;  %v1444_v57 = vadd.f32 %v2687_v11, %v1405_v49 }
 0x318   : > { %v1872_v22 = vpack.c.bf16 %v1439_v26, %v1438_v9  ;;  %v1406_v31 = vmul.f32 %v2680_v2, %v1367_v47  ;;  %2161 = vrsqrt.f32 %v1310_v16  ;;  %v1276_v12 = vmul.f32 0.0078125, %v1225_v29 }
 0x319   : > { %v2152_v32 = vpop.eup %2151  ;;  %v1311_v13 = vadd.f32 1e-05, %v1279_v10  ;;  %v1403_v15 = vmul.f32 %v2680_v2, %v1364_v52 }
 0x31a   : > { %v2154_v14 = vpop.eup %2153  ;;  %1873 = vst [vmem:[%s2701_s24] sm:$0xff] %v1872_v22   ;;  %v1445_v18 = vadd.f32 %v2687_v11, %v1406_v31  ;;  %v1365_v58 = vmul.f32 %v2152_v32, %v2547_v21  ;;  %v1308_v40 = vadd.f32 1e-05, %v1276_v12  ;;  %v1227_v42 = vpop.xlane.xlu1 %1226 }
 0x31b   : > { %v1370_v45 = vmul.f32 %v2154_v14, %v2554_v6  ;;  %2163 = vrsqrt.f32 %v1311_v13  ;;  %v1277_v60 = vmul.f32 0.0078125, %v1227_v42  ;;  %v1237_v48 = vpop.xlane.xlu0 %1236  ;;  %v1442_v21 = vadd.f32 %v2687_v11, %v1403_v15 }
 0x31c   : > { %v1887_v34 = vpack.c.bf16 %v1445_v18, %v1444_v57  ;;  %v1404_v50 = vmul.f32 %v2680_v2, %v1365_v58  ;;  %2165 = vrsqrt.f32 %v1308_v40  ;;  %v1282_v25 = vmul.f32 0.0078125, %v1237_v48 }
 0x31d   : > { %v2156_v53 = vpop.eup %2155  ;;  %v1409_v55 = vmul.f32 %v2680_v2, %v1370_v45  ;;  %v1309_v56 = vadd.f32 1e-05, %v1277_v60 }
 0x31e   : > { %v2158_v1 = vpop.eup %2157  ;;  %1951 = vst [vmem:[%s2701_s24 + $0x18] sm:$0xff] %v1887_v34   ;;  %v1443_v61 = vadd.f32 %v2687_v11, %v1404_v50  ;;  %v1371_v6 = vmul.f32 %v2156_v53, %v2557_v27  ;;  %v1314_v63 = vadd.f32 1e-05, %v1282_v25  ;;  %v1239_v0 = vpop.xlane.xlu1 %1238 }
 0x31f   : > { %v1368_v37 = vmul.f32 %v2158_v1, %v2564_v20  ;;  %2167 = vrsqrt.f32 %v1309_v56  ;;  %v1283_v49 = vmul.f32 0.0078125, %v1239_v0  ;;  %v1233_v3 = vpop.xlane.xlu0 %1232  ;;  %v1448_v16 = vadd.f32 %v2687_v11, %v1409_v55 }
 0x320   : > { %v1882_v4 = vpack.c.bf16 %v1443_v61, %v1442_v21  ;;  %v1410_v9 = vmul.f32 %v2680_v2, %v1371_v6  ;;  %2169 = vrsqrt.f32 %v1314_v63  ;;  %v1280_v26 = vmul.f32 0.0078125, %v1233_v3 }
 0x321   : > { %v2160_v47 = vpop.eup %2159  ;;  %v1315_v17 = vadd.f32 1e-05, %v1283_v49  ;;  %v1407_v10 = vmul.f32 %v2680_v2, %v1368_v37 }
 0x322   : > { %v2162_v52 = vpop.eup %2161  ;;  %1950 = vst [vmem:[%s2701_s24 + $0x10] sm:$0xff] %v1882_v4   ;;  %v1449_v27 = vadd.f32 %v2687_v11, %v1410_v9  ;;  %v1369_v20 = vmul.f32 %v2160_v47, %v2567_v30  ;;  %v1312_v29 = vadd.f32 1e-05, %v1280_v26  ;;  %v1235_v22 = vpop.xlane.xlu1 %1234 }
 0x323   : > { %v1374_v31 = vmul.f32 %v2162_v52, %v2574_v39  ;;  %2171 = vrsqrt.f32 %v1315_v17  ;;  %v1281_v12 = vmul.f32 0.0078125, %v1235_v22  ;;  %v1245_v32 = vpop.xlane.xlu0 %1244  ;;  %v1446_v30 = vadd.f32 %v2687_v11, %v1407_v10 }
 0x324   : > { %v1897_v57 = vpack.c.bf16 %v1449_v27, %v1448_v16  ;;  %v1408_v13 = vmul.f32 %v2680_v2, %v1369_v20  ;;  %2173 = vrsqrt.f32 %v1312_v29  ;;  %v1286_v14 = vmul.f32 0.0078125, %v1245_v32 }
 0x325   : > { %v2164_v18 = vpop.eup %2163  ;;  %v1413_v15 = vmul.f32 %v2680_v2, %v1374_v31  ;;  %v1313_v58 = vadd.f32 1e-05, %v1281_v12 }
 0x326   : > { %v2166_v40 = vpop.eup %2165  ;;  %1953 = vst [vmem:[%s2701_s24 + $0x28] sm:$0xff] %v1897_v57   ;;  %v1447_v42 = vadd.f32 %v2687_v11, %v1408_v13  ;;  %v1375_v39 = vmul.f32 %v2164_v18, %v2577_v35  ;;  %v1318_v45 = vadd.f32 1e-05, %v1286_v14  ;;  %v1247_v60 = vpop.xlane.xlu1 %1246 }
 0x327   : > { %v1372_v48 = vmul.f32 %v2166_v40, %v2584_v19  ;;  %2175 = vrsqrt.f32 %v1313_v58  ;;  %v1287_v34 = vmul.f32 0.0078125, %v1247_v60  ;;  %v1241_v50 = vpop.xlane.xlu0 %1240  ;;  %v1452_v1 = vadd.f32 %v2687_v11, %v1413_v15 }
 0x328   : > { %v1892_v25 = vpack.c.bf16 %v1447_v42, %v1446_v30  ;;  %v1414_v53 = vmul.f32 %v2680_v2, %v1375_v39  ;;  %2177 = vrsqrt.f32 %v1318_v45  ;;  %v1284_v55 = vmul.f32 0.0078125, %v1241_v50 }
 0x329   : > { %v2168_v56 = vpop.eup %2167  ;;  %v1319_v21 = vadd.f32 1e-05, %v1287_v34  ;;  %v1411_v6 = vmul.f32 %v2680_v2, %v1372_v48 }
 0x32a   : > { %v2170_v61 = vpop.eup %2169  ;;  %1952 = vst [vmem:[%s2701_s24 + $0x20] sm:$0xff] %v1892_v25   ;;  %v1453_v35 = vadd.f32 %v2687_v11, %v1414_v53  ;;  %v1373_v19 = vmul.f32 %v2168_v56, %v2587_v38  ;;  %v1316_v63 = vadd.f32 1e-05, %v1284_v55  ;;  %v1243_v0 = vpop.xlane.xlu1 %1242 }
 0x32b   : > { %v1378_v37 = vmul.f32 %v2170_v61, %v2594_v24  ;;  %2179 = vrsqrt.f32 %v1319_v21  ;;  %v1285_v49 = vmul.f32 0.0078125, %v1243_v0  ;;  %v1253_v3 = vpop.xlane.xlu0 %1252  ;;  %v1450_v38 = vadd.f32 %v2687_v11, %v1411_v6 }
 0x32c   : > { %v1907_v4 = vpack.c.bf16 %v1453_v35, %v1452_v1  ;;  %v1412_v9 = vmul.f32 %v2680_v2, %v1373_v19  ;;  %2181 = vrsqrt.f32 %v1316_v63  ;;  %v1290_v26 = vmul.f32 0.0078125, %v1253_v3 }
 0x32d   : > { %v2172_v47 = vpop.eup %2171  ;;  %v1417_v16 = vmul.f32 %v2680_v2, %v1378_v37  ;;  %v1317_v17 = vadd.f32 1e-05, %v1285_v49 }
 0x32e   : > { %v2174_v52 = vpop.eup %2173  ;;  %1955 = vst [vmem:[%s2701_s24 + $0x38] sm:$0xff] %v1907_v4   ;;  %v1451_v27 = vadd.f32 %v2687_v11, %v1412_v9  ;;  %v1379_v24 = vmul.f32 %v2172_v47, %v2597_v43  ;;  %v1322_v10 = vadd.f32 1e-05, %v1290_v26  ;;  %v1255_v20 = vpop.xlane.xlu1 %1254 }
 0x32f   : > { %v1376_v29 = vmul.f32 %v2174_v52, %v2604_v28  ;;  %2183 = vrsqrt.f32 %v1317_v17  ;;  %v1291_v22 = vmul.f32 0.0078125, %v1255_v20  ;;  %v1249_v31 = vpop.xlane.xlu0 %1248  ;;  %v1456_v14 = vadd.f32 %v2687_v11, %v1417_v16 }
 0x330   : > { %v1902_v12 = vpack.c.bf16 %v1451_v27, %v1450_v38  ;;  %v1418_v32 = vmul.f32 %v2680_v2, %v1379_v24  ;;  %2185 = vrsqrt.f32 %v1322_v10  ;;  %v1288_v57 = vmul.f32 0.0078125, %v1249_v31 }
 0x331   : > { %v2176_v13 = vpop.eup %2175  ;;  %v1323_v18 = vadd.f32 1e-05, %v1291_v22  ;;  %v1415_v58 = vmul.f32 %v2680_v2, %v1376_v29 }
 0x332   : > { %v2178_v15 = vpop.eup %2177  ;;  %1954 = vst [vmem:[%s2701_s24 + $0x30] sm:$0xff] %v1902_v12   ;;  %v1457_v43 = vadd.f32 %v2687_v11, %v1418_v32  ;;  %v1377_v28 = vmul.f32 %v2176_v13, %v2607_v46  ;;  %v1320_v40 = vadd.f32 1e-05, %v1288_v57  ;;  %v1251_v30 = vpop.xlane.xlu1 %1250 }
 0x333   : > { %v1382_v42 = vmul.f32 %v2178_v15, %v2614_v33  ;;  %2187 = vrsqrt.f32 %v1323_v18  ;;  %v1289_v39 = vmul.f32 0.0078125, %v1251_v30  ;;  %v1257_v45 = vpop.xlane.xlu0 %1256  ;;  %v1454_v46 = vadd.f32 %v2687_v11, %v1415_v58 }
 0x334   : > { %v1917_v60 = vpack.c.bf16 %v1457_v43, %v1456_v14  ;;  %v1416_v48 = vmul.f32 %v2680_v2, %v1377_v28  ;;  %2189 = vrsqrt.f32 %v1320_v40  ;;  %v1292_v34 = vmul.f32 0.0078125, %v1257_v45 }
 0x335   : > { %v2180_v50 = vpop.eup %2179  ;;  %v1421_v25 = vmul.f32 %v2680_v2, %v1382_v42  ;;  %v1321_v53 = vadd.f32 1e-05, %v1289_v39 }
 0x336   : > { %v2182_v55 = vpop.eup %2181  ;;  %1957 = vst [vmem:[%s2701_s24 + $0x48] sm:$0xff] %v1917_v60   ;;  %v1455_v56 = vadd.f32 %v2687_v11, %v1416_v48  ;;  %v1383_v33 = vmul.f32 %v2180_v50, %v2617_v51  ;;  %v1324_v1 = vadd.f32 1e-05, %v1292_v34  ;;  %v1259_v21 = vpop.xlane.xlu1 %1258 }
 0x337   : > { %v1380_v61 = vmul.f32 %v2182_v55, %v2624_v36  ;;  %2191 = vrsqrt.f32 %v1321_v53  ;;  %v1293_v35 = vmul.f32 0.0078125, %v1259_v21  ;;  %v1261_v6 = vpop.xlane.xlu0 %1260  ;;  %v1460_v49 = vadd.f32 %v2687_v11, %v1421_v25 }
 0x338   : > { %v1912_v19 = vpack.c.bf16 %v1455_v56, %v1454_v46  ;;  %v1422_v63 = vmul.f32 %v2680_v2, %v1383_v33  ;;  %2193 = vrsqrt.f32 %v1324_v1  ;;  %v1294_v0 = vmul.f32 0.0078125, %v1261_v6 }
 0x339   : > { %v2184_v37 = vpop.eup %2183  ;;  %v1325_v3 = vadd.f32 1e-05, %v1293_v35  ;;  %v1419_v9 = vmul.f32 %v2680_v2, %v1380_v61 }
 0x33a   : > { %v2186_v4 = vpop.eup %2185  ;;  %1956 = vst [vmem:[%s2701_s24 + $0x40] sm:$0xff] %v1912_v19   ;;  %v1461_v51 = vadd.f32 %v2687_v11, %v1422_v63  ;;  %v1381_v36 = vmul.f32 %v2184_v37, %v2627_v54  ;;  %v1326_v26 = vadd.f32 1e-05, %v1294_v0  ;;  %v1263_v47 = vpop.xlane.xlu1 %1262 }
 0x33b   : > { %v1386_v16 = vmul.f32 %v2186_v4, %v2634_v41  ;;  %2195 = vrsqrt.f32 %v1325_v3  ;;  %v1295_v17 = vmul.f32 0.0078125, %v1263_v47  ;;  %v1458_v20 = vadd.f32 %v2687_v11, %v1419_v9 }
 0x33c   : > { %v1927_v52 = vpack.c.bf16 %v1461_v51, %v1460_v49  ;;  %v1420_v38 = vmul.f32 %v2680_v2, %v1381_v36  ;;  %2197 = vrsqrt.f32 %v1326_v26 }
 0x33d   : > { %v2188_v27 = vpop.eup %2187  ;;  %v1327_v24 = vadd.f32 1e-05, %v1295_v17  ;;  %v1425_v54 = vmul.f32 %v2680_v2, %v1386_v16 }
 0x33e   : > { %v2190_v10 = vpop.eup %2189  ;;  %1959 = vst [vmem:[%s2701_s24 + $0x58] sm:$0xff] %v1927_v52   ;;  %v1459_v29 = vadd.f32 %v2687_v11, %v1420_v38  ;;  %v1387_v22 = vmul.f32 %v2188_v27, %v2637_v59 }
 0x33f   : > { %v1384_v41 = vmul.f32 %v2190_v10, %v2644_v44  ;;  %2199 = vrsqrt.f32 %v1327_v24  ;;  %v1464_v13 = vadd.f32 %v2687_v11, %v1425_v54 }
 0x340   : > { %v1922_v31 = vpack.c.bf16 %v1459_v29, %v1458_v20  ;;  %v1426_v12 = vmul.f32 %v2680_v2, %v1387_v22 }
 0x341   : > { %v2192_v32 = vpop.eup %2191  ;;  %v1423_v18 = vmul.f32 %v2680_v2, %v1384_v41 }
 0x342   : > { %v2194_v57 = vpop.eup %2193  ;;  %1958 = vst [vmem:[%s2701_s24 + $0x50] sm:$0xff] %v1922_v31   ;;  %v1465_v14 = vadd.f32 %v2687_v11, %v1426_v12  ;;  %v1385_v15 = vmul.f32 %v2192_v32, %v2647_v62 }
 0x343   : > { %v1388_v59 = vmul.f32 %v2194_v57, %v2654_v5  ;;  %v1462_v40 = vadd.f32 %v2687_v11, %v1423_v18 }
 0x344   : > { %v1937_v44 = vpack.c.bf16 %v1465_v14, %v1464_v13  ;;  %v1424_v43 = vmul.f32 %v2680_v2, %v1385_v15 }
 0x345   : > { %v2196_v58 = vpop.eup %2195  ;;  %v1427_v42 = vmul.f32 %v2680_v2, %v1388_v59 }
 0x346   : > { %v2198_v28 = vpop.eup %2197  ;;  %1961 = vst [vmem:[%s2701_s24 + $0x68] sm:$0xff] %v1937_v44   ;;  %v1463_v30 = vadd.f32 %v2687_v11, %v1424_v43  ;;  %v1389_v39 = vmul.f32 %v2196_v58, %v2659_v8 }
 0x347   : > { %v1390_v62 = vmul.f32 %v2198_v28, %v2664_v7  ;;  %v1466_v48 = vadd.f32 %v2687_v11, %v1427_v42 }
 0x348   : > { %v1932_v45 = vpack.c.bf16 %v1463_v30, %v1462_v40  ;;  %v1428_v5 = vmul.f32 %v2680_v2, %v1389_v39 }
 0x349   : > { %v2200_v60 = vpop.eup %2199  ;;  %v1429_v50 = vmul.f32 %v2680_v2, %v1390_v62 }
 0x34a   : > { %1960 = vst [vmem:[%s2701_s24 + $0x60] sm:$0xff] %v1932_v45   ;;  %v1467_v34 = vadd.f32 %v2687_v11, %v1428_v5  ;;  %v1391_v25 = vmul.f32 %v2200_v60, %v2669_v23 }
 0x34b   : > { %v1468_v8 = vadd.f32 %v2687_v11, %v1429_v50 }
 0x34c   : > { %v1942_v53 = vpack.c.bf16 %v1467_v34, %v1466_v48  ;;  %v1430_v55 = vmul.f32 %v2680_v2, %v1391_v25 }
 0x34e   : > { %1962 = vst [vmem:[%s2701_s24 + $0x70] sm:$0xff] %v1942_v53   ;;  %v1469_v7 = vadd.f32 %v2687_v11, %v1430_v55 }
 0x350   : > { %v1947_v46 = vpack.c.bf16 %v1469_v7, %v1468_v8 }
 0x352   : > { %1963 = vst [vmem:[%s2701_s24 + $0x78] sm:$0xff] %v1947_v46  }
 0x353 PF: > { %s24_s10 = sadd.s32 1, %s2221_s10  }
 0x354   : > { %p21_p1 = scmp.ge.s32.totalorder %s24_s10, 6  }
 0x356   :  { %23 = sbr.rel (!%p21_p1) target bundleno = 16 (0x10), region = 96 }

</bundles_post_ra>
